<compile_context>
chip_gen: v6e
topology: v6e:2x2x1
jax: 0.10.0
libtpu: 0.0.40
codegen_flags: <defaults>
</compile_context>

<pallas_src>
import jax
import jax.numpy as jnp
from jax import lax
from jax.experimental import pallas as pl
from jax.experimental.pallas import tpu as pltpu

_LANES = 128
_SUBLANES = 8
_VREG_ELEMS = _SUBLANES * _LANES          # 1024
_MAX_TILE_ROWS = 1024                     # (1024,128) f32 = 512 KiB per buffer


def _cdiv(a, b):
    return (a + b - 1) // b


def _num_megacore_tensorcores():
    """2 on megacore chips (v4 / v5p / 7x), else 1.  Never raises."""
    try:
        kind = jax.devices()[0].device_kind.lower()
    except Exception:
        return 1
    if any(tag in kind for tag in ("v4", "v5p", "7x", "v7")):
        return 2
    return 1


def _choose_tile_rows(rows, ncores):
    """Largest 8 * 2**k that is <= min(MAX_TILE_ROWS, rows, ceil(rows/ncores)).
    Power-of-two (times 8) so the sublane tree reduction stays on 8-row
    boundaries; <= rows so no block is larger than the array."""
    target = min(_MAX_TILE_ROWS, rows, max(_SUBLANES, _cdiv(rows, ncores)))
    tr = _SUBLANES
    while tr * 2 <= target:
        tr *= 2
    return tr


def _focal_loss_tile(x, t, *, alpha, gamma):
    """Elementwise focal loss on f32 tiles.

    Assumes binary targets (the module's documented contract), which allows
    the sign-flip identity and keeps the EUP count at 3 transcendentals/elem.
    # TODO(synk): soft (non-binary) targets would need the probs/p_t
    # interpolation form instead of the sign-flip identity.
    """
    z = x * (2.0 * t - 1.0)                  # z = x if t==1 else -x ; |z|==|x|
    e = jnp.exp(-jnp.abs(x))                 # EUP exp (shared)
    log1pe = jnp.log1p(e)                    # EUP log
    ce = jnp.maximum(-z, 0.0) + log1pe       # BCE-with-logits = softplus(-z)
    sp = jnp.maximum(z, 0.0) + log1pe        # softplus(z)
    focal = jnp.exp(-gamma * sp)             # (1 - p_t) ** gamma, EUP exp
    return (alpha * focal) * ce


def _sublane_tree_sum(v):
    """(R, 128) -> (8, 128) by pairwise halving (R must be 8 * 2**k).
    Pure VPU adds on 8-row-aligned static slices, log-depth dependency chain,
    no XLU work inside the loop."""
    r = v.shape[0]
    while r > _SUBLANES:
        r //= 2
        v = v[:r, :] + v[r:, :]
    return v


def _tile_mask(base, n, shape):
    """Mask of real (non-padding) elements for a tile starting at base."""
    rows, cols = shape
    row_ids = lax.broadcasted_iota(jnp.int32, shape, 0)
    lane_ids = lax.broadcasted_iota(jnp.int32, shape, 1)
    return (base + row_ids * cols + lane_ids) < n


def _make_reduce_kernel(*, alpha, gamma, n, tile_rows, tiles_per_core):
    tile_elems = tile_rows * _LANES

    def kernel(x_ref, t_ref, out_ref):
        c = pl.program_id(0)     # "parallel" core axis (size 1 on v5e/v6e)
        i = pl.program_id(1)     # "arbitrary" streaming/reduction axis

        @pl.when(i == 0)
        def _init():
            # Output block index is constant along i -> resident accumulator.
            out_ref[...] = jnp.zeros_like(out_ref)

        x = x_ref[...].astype(jnp.float32)
        t = t_ref[...].astype(jnp.float32)
        loss = _focal_loss_tile(x, t, alpha=alpha, gamma=gamma)

        base = (c * tiles_per_core + i) * tile_elems

        @pl.when(base + tile_elems <= n)          # fast path: tile is all-real
        def _full():
            out_ref[...] += _sublane_tree_sum(loss)

        @pl.when(base + tile_elems > n)           # only ragged/overhang tiles
        def _ragged():
            keep = _tile_mask(base, n, loss.shape)
            out_ref[...] += _sublane_tree_sum(jnp.where(keep, loss, 0.0))

    return kernel


def _make_elementwise_kernel(*, alpha, gamma):
    def kernel(x_ref, t_ref, out_ref):
        x = x_ref[...].astype(jnp.float32)
        t = t_ref[...].astype(jnp.float32)
        loss = _focal_loss_tile(x, t, alpha=alpha, gamma=gamma)
        out_ref[...] = loss.astype(out_ref.dtype)   # native dtype writes
    return kernel


def focal_loss(inputs, targets, *, alpha=0.25, gamma=2.0, reduction="mean"):
    """inputs: logits (before sigmoid); targets: binary labels, same shape."""
    assert inputs.shape == targets.shape
    orig_shape = inputs.shape
    x1d = inputs.reshape(-1)
    t1d = targets.reshape(-1)
    n = int(x1d.shape[0])
    alpha = float(alpha)
    gamma = float(gamma)

    # Pad only to the 1024-element vreg granularity (no pad if already aligned).
    n_pad = _cdiv(n, _VREG_ELEMS) * _VREG_ELEMS
    rows = n_pad // _LANES
    assert n_pad + _MAX_TILE_ROWS * _LANES < 2 ** 31, "int32 index math limit"

    def to2d(a):
        # Keep the native HBM dtype (bf16 stays bf16 -> half the DMA bytes).
        if n_pad != n:
            a = jnp.pad(a, (0, n_pad - n))
        return a.reshape(rows, _LANES)

    x2d, t2d = to2d(x1d), to2d(t1d)

    if reduction in ("mean", "sum"):
        ncores = _num_megacore_tensorcores()
        tile_rows = _choose_tile_rows(rows, ncores)
        total_tiles = _cdiv(rows, tile_rows)
        ncores = min(ncores, total_tiles)
        tiles_per_core = _cdiv(total_tiles, ncores)
        last_block = total_tiles - 1

        def idx_map(c, i):
            # Clamp: an overhanging (c, i) grid point (when total_tiles is not
            # a multiple of ncores) re-reads the last real block; its
            # contribution is zeroed by the index mask in the kernel.
            return (jnp.minimum(c * tiles_per_core + i, last_block), 0)

        data_spec = pl.BlockSpec((tile_rows, _LANES), idx_map)
        kernel = _make_reduce_kernel(alpha=alpha, gamma=gamma, n=n,
                                     tile_rows=tile_rows,
                                     tiles_per_core=tiles_per_core)
        partial = pl.pallas_call(
            kernel,
            out_shape=jax.ShapeDtypeStruct((_SUBLANES * ncores, _LANES),
                                           jnp.float32),
            grid=(ncores, tiles_per_core),
            in_specs=[data_spec, data_spec],
            out_specs=pl.BlockSpec((_SUBLANES, _LANES), lambda c, i: (c, 0)),
            compiler_params=pltpu.CompilerParams(
                dimension_semantics=("parallel", "arbitrary")),
        )(x2d, t2d)
        total = jnp.sum(partial)          # single tiny cross-lane reduce (8 KiB)
        if reduction == "mean":
            return total / jnp.float32(n)
        return total

    if reduction == "none":
        tile_rows = _choose_tile_rows(rows, 1)
        total_tiles = _cdiv(rows, tile_rows)
        spec = pl.BlockSpec((tile_rows, _LANES), lambda i: (i, 0))
        kernel = _make_elementwise_kernel(alpha=alpha, gamma=gamma)
        out = pl.pallas_call(
            kernel,
            out_shape=jax.ShapeDtypeStruct((rows, _LANES), inputs.dtype),
            grid=(total_tiles,),
            in_specs=[spec, spec],
            out_specs=spec,
            compiler_params=pltpu.CompilerParams(
                dimension_semantics=("arbitrary",)),
        )(x2d, t2d)
        return out.reshape(-1)[:n].reshape(orig_shape)

    raise ValueError(f"Unsupported reduction: {reduction!r}")


def focal_loss_ref(inputs, targets, alpha=0.25, gamma=2.0, reduction="mean"):
    x = inputs.astype(jnp.float32).reshape(-1)
    t = targets.astype(jnp.float32).reshape(-1)
    probs = jax.nn.sigmoid(x)
    ce = jnp.maximum(x, 0.0) - x * t + jnp.log1p(jnp.exp(-jnp.abs(x)))
    p_t = probs * t + (1.0 - probs) * (1.0 - t)
    loss = alpha * (1.0 - p_t) ** gamma * ce
    if reduction == "mean":
        return loss.mean()
    if reduction == "sum":
        return loss.sum()
    return loss.reshape(inputs.shape)


if __name__ == "__main__":
    key = jax.random.PRNGKey(0)
    k1, k2, k3, k4 = jax.random.split(key, 4)

    RTOL, ATOL = 2e-3, 1e-5

    # Small test matching the module's documented usage: 1-D logits / labels.
    batch = 8
    logits = jax.random.normal(k1, (batch,), dtype=jnp.float32)
    labels = jax.random.bernoulli(k2, 0.5, (batch,)).astype(jnp.float32)

    out_mean = jax.block_until_ready(focal_loss(logits, labels, reduction="mean"))
    ref_mean = focal_loss_ref(logits, labels, reduction="mean")
    assert jnp.allclose(out_mean, ref_mean, rtol=RTOL, atol=ATOL), (out_mean, ref_mean)

    out_sum = jax.block_until_ready(focal_loss(logits, labels, reduction="sum"))
    ref_sum = focal_loss_ref(logits, labels, reduction="sum")
    assert jnp.allclose(out_sum, ref_sum, rtol=RTOL, atol=ATOL), (out_sum, ref_sum)

    out_none = jax.block_until_ready(focal_loss(logits, labels, reduction="none"))
    ref_none = focal_loss_ref(logits, labels, reduction="none")
    assert out_none.shape == (batch,)
    assert jnp.allclose(out_none.astype(jnp.float32), ref_none,
                        rtol=RTOL, atol=ATOL)

    # Modest non-vreg-aligned bf16 batch: exercises the tail pad, the ragged
    # masked tile, the multi-tile resident accumulator, and narrow-dtype DMA.
    big = 5000 + 37
    logits_b = jax.random.normal(k3, (big,), dtype=jnp.bfloat16)
    labels_b = jax.random.bernoulli(k4, 0.5, (big,)).astype(jnp.bfloat16)
    out_big = jax.block_until_ready(focal_loss(logits_b, labels_b, reduction="mean"))
    ref_big = focal_loss_ref(logits_b, labels_b, reduction="mean")
    assert jnp.allclose(out_big, ref_big, rtol=5e-3, atol=1e-5), (out_big, ref_big)

    print("KERNEL_OK")
</pallas_src>

<mosaic_0001>
module attributes {stable_mosaic.version = 11 : i64} {
  func.func @kernel(%arg0: i32, %arg1: i32, %arg2: memref<8x128xf32, #tpu.memory_space<vmem>>, %arg3: memref<8x128xf32, #tpu.memory_space<vmem>>, %arg4: memref<8x128xf32, #tpu.memory_space<vmem>>) attributes {dimension_semantics = [#tpu.dimension_semantics<parallel>, #tpu.dimension_semantics<arbitrary>], iteration_bounds = array<i64: 1, 1>, scalar_prefetch = 0 : i64, scratch_operands = 0 : i64, tpu.core_type = #tpu.core_type<tc>, window_params = [{transform_indices = @transform_0, window_bounds = array<i64: 8, 128>}, {transform_indices = @transform_1, window_bounds = array<i64: 8, 128>}, {transform_indices = @transform_2, window_bounds = array<i64: 8, 128>}]} {
    %c0_i32 = arith.constant 0 : i32
    %0 = arith.cmpi eq, %arg1, %c0_i32 : i32
    %1 = arith.extui %0 : i1 to i32
    %c0_i32_0 = arith.constant 0 : i32
    %2 = arith.cmpi ne, %1, %c0_i32_0 : i32
    scf.if %2 {
      %cst_16 = arith.constant 0.000000e+00 : f32
      %40 = vector.broadcast %cst_16 : f32 to vector<8x128xf32>
      %c0_17 = arith.constant 0 : index
      %c0_18 = arith.constant 0 : index
      %41 = vector.load %arg4[%c0_17, %c0_18] : memref<8x128xf32, #tpu.memory_space<vmem>>, vector<8x128xf32>
      tpu.vector_store %arg4[%c0_17, %c0_18], %40 {strides = array<i32>} : memref<8x128xf32, #tpu.memory_space<vmem>>, vector<8x128xf32>,
    } else {
    }
    %c0 = arith.constant 0 : index
    %c0_1 = arith.constant 0 : index
    %3 = vector.load %arg2[%c0, %c0_1] : memref<8x128xf32, #tpu.memory_space<vmem>>, vector<8x128xf32>
    %c0_2 = arith.constant 0 : index
    %c0_3 = arith.constant 0 : index
    %4 = vector.load %arg3[%c0_2, %c0_3] : memref<8x128xf32, #tpu.memory_space<vmem>>, vector<8x128xf32>
    %cst = arith.constant 2.000000e+00 : f32
    %5 = vector.broadcast %cst : f32 to vector<8x128xf32>
    %6 = arith.mulf %5, %4 : vector<8x128xf32>
    %cst_4 = arith.constant 1.000000e+00 : f32
    %7 = vector.broadcast %cst_4 : f32 to vector<8x128xf32>
    %8 = arith.subf %6, %7 : vector<8x128xf32>
    %9 = arith.mulf %3, %8 : vector<8x128xf32>
    %10 = math.absf %3 : vector<8x128xf32>
    %cst_5 = arith.constant 0.000000e+00 : f32
    %11 = vector.broadcast %cst_5 : f32 to vector<8x128xf32>
    %12 = arith.subf %11, %10 : vector<8x128xf32>
    %13 = math.exp %12 : vector<8x128xf32>
    %14 = math.log1p %13 : vector<8x128xf32>
    %cst_6 = arith.constant 0.000000e+00 : f32
    %15 = vector.broadcast %cst_6 : f32 to vector<8x128xf32>
    %16 = arith.subf %15, %9 : vector<8x128xf32>
    %cst_7 = arith.constant 0.000000e+00 : f32
    %17 = vector.broadcast %cst_7 : f32 to vector<8x128xf32>
    %18 = arith.maximumf %16, %17 : vector<8x128xf32>
    %19 = arith.addf %18, %14 : vector<8x128xf32>
    %cst_8 = arith.constant 0.000000e+00 : f32
    %20 = vector.broadcast %cst_8 : f32 to vector<8x128xf32>
    %21 = arith.maximumf %9, %20 : vector<8x128xf32>
    %22 = arith.addf %21, %14 : vector<8x128xf32>
    %cst_9 = arith.constant -2.000000e+00 : f32
    %23 = vector.broadcast %cst_9 : f32 to vector<8x128xf32>
    %24 = arith.mulf %23, %22 : vector<8x128xf32>
    %25 = math.exp %24 : vector<8x128xf32>
    %cst_10 = arith.constant 2.500000e-01 : f32
    %26 = vector.broadcast %cst_10 : f32 to vector<8x128xf32>
    %27 = arith.mulf %26, %25 : vector<8x128xf32>
    %28 = arith.mulf %27, %19 : vector<8x128xf32>
    %c1_i32 = arith.constant 1 : i32
    %29 = arith.muli %arg0, %c1_i32 : i32
    %30 = arith.addi %29, %arg1 : i32
    %c1024_i32 = arith.constant 1024 : i32
    %31 = arith.muli %30, %c1024_i32 : i32
    %c1024_i32_11 = arith.constant 1024 : i32
    %32 = arith.addi %31, %c1024_i32_11 : i32
    %c8_i32 = arith.constant 8 : i32
    %33 = arith.cmpi sle, %32, %c8_i32 : i32
    %34 = arith.extui %33 : i1 to i32
    %c0_i32_12 = arith.constant 0 : i32
    %35 = arith.cmpi ne, %34, %c0_i32_12 : i32
    scf.if %35 {
      %c0_16 = arith.constant 0 : index
      %c0_17 = arith.constant 0 : index
      %40 = vector.load %arg4[%c0_16, %c0_17] : memref<8x128xf32, #tpu.memory_space<vmem>>, vector<8x128xf32>
      %41 = arith.addf %40, %28 : vector<8x128xf32>
      %c0_18 = arith.constant 0 : index
      %c0_19 = arith.constant 0 : index
      %42 = vector.load %arg4[%c0_18, %c0_19] : memref<8x128xf32, #tpu.memory_space<vmem>>, vector<8x128xf32>
      tpu.vector_store %arg4[%c0_18, %c0_19], %41 {strides = array<i32>} : memref<8x128xf32, #tpu.memory_space<vmem>>, vector<8x128xf32>,
    } else {
    }
    %c1024_i32_13 = arith.constant 1024 : i32
    %36 = arith.addi %31, %c1024_i32_13 : i32
    %c8_i32_14 = arith.constant 8 : i32
    %37 = arith.cmpi sgt, %36, %c8_i32_14 : i32
    %38 = arith.extui %37 : i1 to i32
    %c0_i32_15 = arith.constant 0 : i32
    %39 = arith.cmpi ne, %38, %c0_i32_15 : i32
    scf.if %39 {
      %40 = tpu.iota {dimensions = array<i32: 0>} : vector<8x128xi32>
      %41 = tpu.iota {dimensions = array<i32: 1>} : vector<8x128xi32>
      %c128_i32 = arith.constant 128 : i32
      %42 = vector.broadcast %c128_i32 : i32 to vector<8x128xi32>
      %43 = arith.muli %40, %42 : vector<8x128xi32>
      %44 = vector.broadcast %31 : i32 to vector<8x128xi32>
      %45 = arith.addi %44, %43 : vector<8x128xi32>
      %46 = arith.addi %45, %41 : vector<8x128xi32>
      %c8_i32_16 = arith.constant 8 : i32
      %47 = vector.broadcast %c8_i32_16 : i32 to vector<8x128xi32>
      %48 = arith.cmpi slt, %46, %47 : vector<8x128xi32>
      %c0_17 = arith.constant 0 : index
      %c0_18 = arith.constant 0 : index
      %49 = vector.load %arg4[%c0_17, %c0_18] : memref<8x128xf32, #tpu.memory_space<vmem>>, vector<8x128xf32>
      %cst_19 = arith.constant 0.000000e+00 : f32
      %50 = vector.broadcast %cst_19 : f32 to vector<8x128xf32>
      %51 = arith.select %48, %28, %50 : vector<8x128xi1>, vector<8x128xf32>
      %52 = arith.addf %49, %51 : vector<8x128xf32>
      %c0_20 = arith.constant 0 : index
      %c0_21 = arith.constant 0 : index
      %53 = vector.load %arg4[%c0_20, %c0_21] : memref<8x128xf32, #tpu.memory_space<vmem>>, vector<8x128xf32>
      tpu.vector_store %arg4[%c0_20, %c0_21], %52 {strides = array<i32>} : memref<8x128xf32, #tpu.memory_space<vmem>>, vector<8x128xf32>,
    } else {
    }
    return
  }
  func.func @transform_0(%arg0: i32, %arg1: i32) -> (i32, i32) {
    %c1_i32 = arith.constant 1 : i32
    %0 = arith.muli %arg0, %c1_i32 : i32
    %1 = arith.addi %0, %arg1 : i32
    %c0_i32 = arith.constant 0 : i32
    %2 = arith.minsi %1, %c0_i32 : i32
    %c0_i32_0 = arith.constant 0 : i32
    %c0_i32_1 = arith.constant 0 : i32
    return %2, %c0_i32_0 : i32, i32
  }
  func.func @transform_1(%arg0: i32, %arg1: i32) -> (i32, i32) {
    %c1_i32 = arith.constant 1 : i32
    %0 = arith.muli %arg0, %c1_i32 : i32
    %1 = arith.addi %0, %arg1 : i32
    %c0_i32 = arith.constant 0 : i32
    %2 = arith.minsi %1, %c0_i32 : i32
    %c0_i32_0 = arith.constant 0 : i32
    %c0_i32_1 = arith.constant 0 : i32
    return %2, %c0_i32_0 : i32, i32
  }
  func.func @transform_2(%arg0: i32, %arg1: i32) -> (i32, i32) {
    %c0_i32 = arith.constant 0 : i32
    %c0_i32_0 = arith.constant 0 : i32
    return %arg0, %c0_i32 : i32, i32
  }
}

</mosaic_0001>

<bundles_post_ra>
// kernel: tpu_custom_call.1
= control target key start
LH: loop header
LB: loop body
LE: loop exit
PB: predicated region body
PF: predicated region fallthrough
CT: control target
= control target key end

     0   :  { %7 = vsyncpa [#allocation3], 0  ;;  %s236_s0 = inlined_call_operand.hbm [shape: f32[8,128], index: 0, kind: input, shape index: {}]   ;;  %s237_s1 = inlined_call_operand.hbm [shape: f32[8,128], index: 1, kind: input, shape index: {}]   ;;  %s238_s2 = inlined_call_operand.hbm [shape: f32[8,128], index: 2, kind: output, shape index: {}]  }
   0x1   :  { %8 = vsyncpa [#allocation6], 0 }
   0x2   :  { %9 = vsyncpa [#allocation4], 0  ;;  %s209_s9 = smov [#allocation2]   ;;  %s210_s11 = smov [#allocation5]  }
   0x3   :  { %s21_s10 = sshll.u32 %s209_s9, 4  ;;  %s36_s12 = sshll.u32 %s210_s11, 4  ;;  %s22_s10 = int_to_ptr.vmem [resolvable:$true] %s21_s10  ;;  %s37_s12 = int_to_ptr.vmem [resolvable:$true] %s36_s12 }
   0x4   :  { %s151_s13 = scalar_lea.vmem %s22_s10, 128  ;;  %p156_p1 = scmp.lt.s32.totalorder %s22_s10, %s22_s10 }
   0x5   :  { %p152_p0 = scmp.ne.s32.totalorder %s22_s10, %s151_s13  ;;  %p157_p2 = scmp.lt.s32.totalorder %s151_s13, %s151_s13 }
   0x7   :  { %p158_p3 = por %p157_p2, %p156_p1 }
   0x9   :  { %p159_p4 = pnand %p158_p3, %p152_p0 }
   0xb   :  { %162 = shalt.err (!%p159_p4)
}
   0xc   :  { %24 = dma.hbm_to_vmem [thread:$0]  %s236_s0, 128, %s22_s10, [#allocation3]  }
   0xd   :  { %s171_s16 = scalar_lea.vmem %s37_s12, 128  ;;  %p176_p6 = scmp.lt.s32.totalorder %s37_s12, %s37_s12 }
   0xe   :  { %p172_p5 = scmp.ne.s32.totalorder %s37_s12, %s171_s16  ;;  %p177_p7 = scmp.lt.s32.totalorder %s171_s16, %s171_s16 }
  0x10   :  { %p178_p8 = por %p177_p7, %p176_p6 }
  0x12   :  { %p179_p9 = pnand %p178_p8, %p172_p5 }
  0x14   :  { %182 = shalt.err (!%p179_p9)
}
  0x15   :  { %39 = dma.hbm_to_vmem [thread:$0]  %s237_s1, 128, %s37_s12, [#allocation6]  }
  0x16   :  { %203 = dma.done.wait [#allocation3], 128  }
  0x17   :  { %204 = vsyncadd [#allocation3], 4294967168 }
  0x18   :  { %205 = dma.done.wait [#allocation6], 128  }
  0x19   :  { %206 = vsyncadd [#allocation6], 4294967168  ;;  %v57_v0 = vld [vmem:[#allocation2] sm:$0xff]  ;;  %v58_v5 = vld [vmem:[#allocation5] sm:$0xff]  ;;  %v99_v21 = vlaneseq  ;;  %s211_s0 = smov [#allocation7]  }
  0x1a   :  { %v62_v1 = vand.u32 2147483647, %v57_v0  ;;  %v59_v7 = vmul.f32 2.0, %v58_v5  ;;  %s118_s1 = sshll.u32 %s211_s0, 4  ;;  %s119_s1 = int_to_ptr.vmem [resolvable:$true] %s118_s1 }
  0x1b   :  { %v100_v22 = vshrl.u32 %v99_v21, 7  ;;  %v102_v24 = vand.u32 127, %v99_v21  ;;  %s183_s19 = scalar_lea.vmem %s119_s1, 128  ;;  %p188_p11 = scmp.lt.s32.totalorder %s119_s1, %s119_s1 }
  0x1c   :  { %v63_v2 = vsub.f32 0.0, %v62_v1  ;;  %v132_v9 = vadd.f32 -1.0, %v59_v7  ;;  %p184_p10 = scmp.ne.s32.totalorder %s119_s1, %s183_s19  ;;  %p189_p12 = scmp.lt.s32.totalorder %s183_s19, %s183_s19 }
  0x1d   :  { %v103_v25 = vmul.u32 128, %v100_v22 }
  0x1e   :  { %v64_v3 = vmul.f32 1.442695, %v63_v2  ;;  %v61_v11 = vmul.f32 %v132_v9, %v57_v0  ;;  %p190_p13 = por %p189_p12, %p188_p11 }
  0x1f   :  { %v106_v27 = vadd.s32 %v103_v25, %v102_v24 }
  0x20   :  { %137 = vpow2.f32 %v64_v3  ;;  %v78_v15 = vmax.f32 %v61_v11, 0.0  ;;  %v75_v23 = vsub.f32 0.0, %v61_v11  ;;  %p191_p0 = pnand %p190_p13, %p184_p10 }
  0x21   :  { %vm107_vm1 = vcmp.lt.s32.totalorder %v106_v27, 8 }
  0x22   :  { %v76_v26 = vmax.f32 %v75_v23, 0.0 }
  0x2d   :  { %v138_v4 = vpop.eup %137 }
  0x2e   :  { %v66_v6 = vadd.f32 1.0, %v138_v4  ;;  %v69_v8 = vmul.f32 -0.5, %v138_v4  ;;  %v72_v12 = vand.u32 2147483647, %v138_v4 }
  0x30   :  { %139 = vlog2.f32 %v66_v6  ;;  %v70_v10 = vadd.f32 1.0, %v69_v8  ;;  %vm73_vm0 = vcmp.lt.f32.partialorder %v72_v12, 0.0004427343 }
  0x32   :  { %v71_v13 = vmul.f32 %v138_v4, %v70_v10 }
  0x3d   :  { %v140_v14 = vpop.eup %139 }
  0x3e   :  { %v68_v16 = vmul.f32 0.6931472, %v140_v14 }
  0x40   :  { %v74_v17 = vsel %vm73_vm0, %v71_v13, %v68_v16 }
  0x41   :  { %v79_v18 = vadd.f32 %v78_v15, %v74_v17  ;;  %v77_v28 = vadd.f32 %v76_v26, %v74_v17 }
  0x43   :  { %v80_v19 = vmul.f32 -2.0, %v79_v18 }
  0x45   :  { %v81_v20 = vmul.f32 1.442695, %v80_v19 }
  0x47   :  { %141 = vpow2.f32 %v81_v20 }
  0x54   :  { %v142_v29 = vpop.eup %141 }
  0x55   :  { %v83_v30 = vmul.f32 0.25, %v142_v29 }
  0x57   :  { %v84_v31 = vmul.f32 %v83_v30, %v77_v28 }
  0x59   :  { %v109_v32 = vsel %vm107_vm1, %v84_v31, 0.0 }
  0x5a   :  { %111 = vst [vmem:[#allocation7] sm:$0xff] %v109_v32 }
  0x5b   :  { %194 = shalt.err (!%p191_p0)
}
  0x5c   :  { %121 = dma.vmem_to_hbm [thread:$0]  %s119_s1, 128, %s238_s2, [#allocation4]  }
  0x5d   :  { %207 = dma.done.wait [#allocation4], 128  }
  0x5e   :  { %208 = vsyncadd [#allocation4], 4294967168 }
  0x5f   :  { %125 = vsyncpa [#allocation3], 1 }
  0x60   :  { %126 = vsyncpa [#allocation6], 1 }
  0x61   :  { %127 = vsyncpa [#allocation4], 1 }

</bundles_post_ra>
